<compile_context>
chip_gen: v6e
topology: v6e:2x2x1
jax: 0.10.0
libtpu: 0.0.40
codegen_flags: <defaults>
</compile_context>

<pallas_src>
import jax
import jax.numpy as jnp
from jax import lax
from jax.experimental import pallas as pl
from jax.experimental.pallas import tpu as pltpu


# ---------------------------------------------------------------------------
# kernels
# ---------------------------------------------------------------------------

def _make_tile_kernel(compute_dtype):
    """Per-(head, n-tile) kernel: out = q_tile @ key_t (K contracted)."""
    def kernel(q_ref, kt_ref, out_ref):
        # q_ref: (TN, K), kt_ref: (K, L), out_ref: (TN, L); head dim squeezed.
        q = q_ref[...]
        kt = kt_ref[...]
        if compute_dtype is not None:
            q = q.astype(compute_dtype)
            kt = kt.astype(compute_dtype)
        out_ref[...] = lax.dot_general(
            q, kt,
            dimension_numbers=(((1,), (0,)), ((), ())),
            preferred_element_type=jnp.float32,
        ).astype(out_ref.dtype)
    return kernel


def _make_small_kernel(compute_dtype):
    """Single-step kernel for small configs: batched over heads in one dot."""
    def kernel(q_ref, kt_ref, out_ref):
        # q_ref: (H, L, K), kt_ref: (H, K, L), out_ref: (H, L, L)
        q = q_ref[...]
        kt = kt_ref[...]
        if compute_dtype is not None:
            q = q.astype(compute_dtype)
            kt = kt.astype(compute_dtype)
        out_ref[...] = lax.dot_general(
            q, kt,
            dimension_numbers=(((2,), (1,)), ((0,), (0,))),
            preferred_element_type=jnp.float32,
        ).astype(out_ref.dtype)
    return kernel


# ---------------------------------------------------------------------------
# tiling policy
# ---------------------------------------------------------------------------

def _vmem_capacity_bytes():
    """Physical VMEM of the current generation; conservative fallback (v7x)."""
    try:
        cap = int(pltpu.get_tpu_info().vmem_capacity_bytes)
        if cap > 0:
            return cap
    except Exception:
        pass
    return 64 * 1024 * 1024


def _pick_tn(L, K, budget_bytes, itemsize=4, prefer_max=None):
    """Largest multiple-of-8 divisor of L whose double-buffered tiles fit."""
    cands = [d for d in range(8, L + 1, 8) if L % d == 0]
    if not cands:
        return L  # tiny / non-multiple-of-8 L: full block (equals array dim)

    def resident(t):
        # double-buffered: (t,L) out + (t,K) query tile + (K,L) key factor
        return 2 * (t * L + t * K + K * L) * itemsize

    fitting = [d for d in cands if resident(d) <= budget_bytes]
    pool = fitting if fitting else [min(cands)]
    if prefer_max is not None:
        limited = [d for d in pool if d <= prefer_max]
        if limited:
            pool = limited
    return max(pool)


# ---------------------------------------------------------------------------
# wrapper
# ---------------------------------------------------------------------------

def factorized_random_synthesizer_head(query_fc, key_fc=None, *, tn=None,
                                        compute_dtype=None):
    """out[h] = query_fc[h] @ key_fc[h].T   (key_fc=None => fixed=True path).

    query_fc : (H, L, K) learned factor.
    key_fc   : (H, L, K) learned factor, or None to reuse query_fc.
    tn       : optional explicit query-axis tile (forces the tiled/grid path).
    compute_dtype : optional MXU operand dtype (e.g. jnp.bfloat16); f32 accum.
    """
    if key_fc is None:              # fixed == True
        key_fc = query_fc
    H, L, K = query_fc.shape
    assert key_fc.shape == (H, L, K)
    out_dtype = query_fc.dtype
    itemsize = 4  # f32 tiles

    # Lane-dense MXU feed: key factor as (H, K, L) -> RHS lane dim = L.
    key_t = jnp.swapaxes(key_fc, 1, 2)

    cap = _vmem_capacity_bytes()
    budget = min(int(0.70 * cap), 96 * 1024 * 1024)       # resident-tile budget
    vmem_limit = min(int(0.85 * cap), 112 * 1024 * 1024)  # scoped limit request

    # ---------- single-step path for small problems -------------------------
    total_bytes = (2 * H * L * K + H * L * L) * itemsize
    if tn is None and total_bytes <= min(budget, 8 * 1024 * 1024):
        grid_spec = pltpu.PrefetchScalarGridSpec(
            num_scalar_prefetch=0,
            grid=(1,),
            in_specs=[
                pl.BlockSpec((H, L, K), lambda i: (0, 0, 0)),
                pl.BlockSpec((H, K, L), lambda i: (0, 0, 0)),
            ],
            out_specs=pl.BlockSpec((H, L, L), lambda i: (0, 0, 0)),
        )
        return pl.pallas_call(
            _make_small_kernel(compute_dtype),
            out_shape=jax.ShapeDtypeStruct((H, L, L), out_dtype),
            grid_spec=grid_spec,
            compiler_params=pltpu.CompilerParams(
                dimension_semantics=("arbitrary",),
                vmem_limit_bytes=vmem_limit),
        )(query_fc, key_t)

    # ---------- tiled path ---------------------------------------------------
    if tn is None:
        # If there's only one head, keep >= 2 n-tiles when possible so v7x's
        # two TensorCores both get work (no-op on v5e/v6e).
        prefer_max = None if H > 1 else max(8, L // 2)
        tn = _pick_tn(L, K, budget, itemsize=itemsize, prefer_max=prefer_max)
    assert L % tn == 0, "query-axis tile must divide max_length"

    grid = (H, L // tn)
    grid_spec = pltpu.PrefetchScalarGridSpec(
        num_scalar_prefetch=0,
        grid=grid,
        in_specs=[
            # query factor: one (TN, K) row-tile of head h
            pl.BlockSpec((None, tn, K), lambda h, n: (h, n, 0)),
            # transposed key factor: full (K, L) factor of head h (resident
            # across the n axis; K is the small low-rank dim)
            pl.BlockSpec((None, K, L), lambda h, n: (h, 0, 0)),
        ],
        out_specs=pl.BlockSpec((None, tn, L), lambda h, n: (h, n, 0)),
    )

    return pl.pallas_call(
        _make_tile_kernel(compute_dtype),
        out_shape=jax.ShapeDtypeStruct((H, L, L), out_dtype),
        grid_spec=grid_spec,
        compiler_params=pltpu.CompilerParams(
            # Both axes independent (K-contraction fully in-kernel) -> both may
            # shard across TensorCores on v7x.
            dimension_semantics=("parallel", "parallel"),
            vmem_limit_bytes=vmem_limit),
    )(query_fc, key_t)


def _reference(query_fc, key_fc):
    return jnp.einsum("hnk,hmk->hnm", query_fc, key_fc)


# ---------------------------------------------------------------------------
# demo / self-test
# ---------------------------------------------------------------------------

if __name__ == "__main__":
    # Small config consistent with the module: num_attention_heads=4,
    # max_length=128, k=32.
    H, L, K = 4, 128, 32

    key = jax.random.PRNGKey(0)
    k_q, k_k = jax.random.split(key, 2)

    # xavier_uniform-style init bound (deterministic synthetic weights).
    bound = (6.0 / (L * K + H * K)) ** 0.5
    query_fc = jax.random.uniform(k_q, (H, L, K), jnp.float32, -bound, bound)
    key_fc = jax.random.uniform(k_k, (H, L, K), jnp.float32, -bound, bound)

    # fixed = False variant (single-step small path).
    out = jax.block_until_ready(
        factorized_random_synthesizer_head(query_fc, key_fc))
    ref = _reference(query_fc, key_fc)
    assert out.shape == (H, L, L)
    assert jnp.allclose(out, ref, atol=1e-5, rtol=1e-5), "mismatch (fixed=False)"

    # fixed = True variant (key_fc absent -> reuse query_fc).
    out_fixed = jax.block_until_ready(
        factorized_random_synthesizer_head(query_fc))
    ref_fixed = _reference(query_fc, query_fc)
    assert jnp.allclose(out_fixed, ref_fixed, atol=1e-5, rtol=1e-5), \
        "mismatch (fixed=True)"

    # Explicit tn exercises the tiled/grid path at a still-small shape.
    H2, L2, K2 = 2, 512, 32
    q2 = jax.random.uniform(jax.random.PRNGKey(1), (H2, L2, K2),
                            jnp.float32, -bound, bound)
    k2 = jax.random.uniform(jax.random.PRNGKey(2), (H2, L2, K2),
                            jnp.float32, -bound, bound)
    out2 = jax.block_until_ready(
        factorized_random_synthesizer_head(q2, k2, tn=128))
    ref2 = _reference(q2, k2)
    assert jnp.allclose(out2, ref2, atol=1e-5, rtol=1e-5), "mismatch (tiled)"

    # Optional bf16-operand MXU path (f32 accumulation); looser tolerance.
    out_bf16 = jax.block_until_ready(
        factorized_random_synthesizer_head(query_fc, key_fc,
                                           compute_dtype=jnp.bfloat16))
    assert jnp.allclose(out_bf16, ref, atol=2e-3, rtol=2e-2), "mismatch (bf16)"

    print("KERNEL_OK")
</pallas_src>

<mosaic_0001>
module attributes {stable_mosaic.version = 11 : i64} {
  func.func @kernel(%arg0: i32, %arg1: memref<4x128x32xf32, #tpu.memory_space<vmem>>, %arg2: memref<4x32x128xf32, #tpu.memory_space<vmem>>, %arg3: memref<4x128x128xf32, #tpu.memory_space<vmem>>) attributes {dimension_semantics = [#tpu.dimension_semantics<arbitrary>], iteration_bounds = array<i64: 1>, scalar_prefetch = 0 : i64, scratch_operands = 0 : i64, tpu.core_type = #tpu.core_type<tc>, window_params = [{pipeline_mode = #tpu.pipeline_mode<synchronous>, transform_indices = @transform_0, window_bounds = array<i64: 4, 128, 32>}, {pipeline_mode = #tpu.pipeline_mode<synchronous>, transform_indices = @transform_1, window_bounds = array<i64: 4, 32, 128>}, {pipeline_mode = #tpu.pipeline_mode<synchronous>, transform_indices = @transform_2, window_bounds = array<i64: 4, 128, 128>}]} {
    %c0 = arith.constant 0 : index
    %c0_0 = arith.constant 0 : index
    %c0_1 = arith.constant 0 : index
    %0 = vector.load %arg1[%c0, %c0_0, %c0_1] : memref<4x128x32xf32, #tpu.memory_space<vmem>>, vector<4x128x32xf32>
    %c0_2 = arith.constant 0 : index
    %c0_3 = arith.constant 0 : index
    %c0_4 = arith.constant 0 : index
    %1 = vector.load %arg2[%c0_2, %c0_3, %c0_4] : memref<4x32x128xf32, #tpu.memory_space<vmem>>, vector<4x32x128xf32>
    %cst = arith.constant dense<0.000000e+00> : vector<4x128x128xf32>
    %2 = tpu.matmul %0, %1, %cst {dimension_numbers = #tpu.dot_dimension_numbers<[2], [1], [1], [2], [0, 0, 0, 1, 1, 2], [0], [0]>} : vector<4x128x32xf32>, vector<4x32x128xf32>, vector<4x128x128xf32> -> vector<4x128x128xf32>
    %c0_5 = arith.constant 0 : index
    %c0_6 = arith.constant 0 : index
    %c0_7 = arith.constant 0 : index
    %3 = vector.load %arg3[%c0_5, %c0_6, %c0_7] : memref<4x128x128xf32, #tpu.memory_space<vmem>>, vector<4x128x128xf32>
    tpu.vector_store %arg3[%c0_5, %c0_6, %c0_7], %2 {strides = array<i32>} : memref<4x128x128xf32, #tpu.memory_space<vmem>>, vector<4x128x128xf32>,
    return
  }
  func.func @transform_0(%arg0: i32) -> (i32, i32, i32) {
    %c0_i32 = arith.constant 0 : i32
    %c0_i32_0 = arith.constant 0 : i32
    %c0_i32_1 = arith.constant 0 : i32
    %c0_i32_2 = arith.constant 0 : i32
    return %c0_i32, %c0_i32_0, %c0_i32_1 : i32, i32, i32
  }
  func.func @transform_1(%arg0: i32) -> (i32, i32, i32) {
    %c0_i32 = arith.constant 0 : i32
    %c0_i32_0 = arith.constant 0 : i32
    %c0_i32_1 = arith.constant 0 : i32
    %c0_i32_2 = arith.constant 0 : i32
    return %c0_i32, %c0_i32_0, %c0_i32_1 : i32, i32, i32
  }
  func.func @transform_2(%arg0: i32) -> (i32, i32, i32) {
    %c0_i32 = arith.constant 0 : i32
    %c0_i32_0 = arith.constant 0 : i32
    %c0_i32_1 = arith.constant 0 : i32
    %c0_i32_2 = arith.constant 0 : i32
    return %c0_i32, %c0_i32_0, %c0_i32_1 : i32, i32, i32
  }
}

</mosaic_0001>

<bundles_post_ra>
// kernel: tpu_custom_call.1
= control target key start
LH: loop header
LB: loop body
LE: loop exit
PB: predicated region body
PF: predicated region fallthrough
CT: control target
= control target key end

     0   :  { %vm92_vm0 = vcmask 261120   ;;  %s1567_s0 = inlined_call_operand.vmem [shape: f32[4,128,32], index: 0, kind: input, shape index: {}]   ;;  %s1568_s1 = inlined_call_operand.vmem [shape: f32[4,32,128], index: 1, kind: input, shape index: {}]   ;;  %s1569_s2 = inlined_call_operand.hbm [shape: f32[4,128,128], index: 2, kind: output, shape index: {}]  }
   0x1   :  { %v79_v0 = vld [vmem:[%s1568_s1 + $0x18] sm:$0xff]  ;;  %v78_v2 = vld [vmem:[%s1568_s1 + $0x10] sm:$0xff]  ;;  %v77_v4 = vld [vmem:[%s1568_s1 + $0x8] sm:$0xff] }
   0x2   :  { %v83_v1 = vld [vmem:[%s1568_s1 + $0x38] sm:$0xff]  ;;  %1089 = vmatprep.subr.mxu0 %v79_v0  ;;  %v82_v3 = vld [vmem:[%s1568_s1 + $0x30] sm:$0xff]  ;;  %v81_v5 = vld [vmem:[%s1568_s1 + $0x28] sm:$0xff] }
   0x3   :  { %1121 = vmatprep.subr.mxu1 %v83_v1  ;;  %1090 = vmatpush3.msra.mxu0 %v79_v0  ;;  %v76_v6 = vld [vmem:[%s1568_s1] sm:$0xff]  ;;  %v13_v10 = vld [vmem:[%s1567_s0 + $0x8] sm:$0xff]  ;;  %v87_v12 = vld [vmem:[%s1568_s1 + $0x58] sm:$0xff] }
   0x4   :  { %1122 = vmatpush3.msra.mxu1 %v83_v1  ;;  %1091 = vmatprep.subr.mxu0 %v78_v2  ;;  %v80_v7 = vld [vmem:[%s1568_s1 + $0x20] sm:$0xff]  ;;  %v29_v11 = vld [vmem:[%s1567_s0 + $0x88] sm:$0xff]  ;;  %v91_v13 = vld [vmem:[%s1568_s1 + $0x78] sm:$0xff] }
   0x5   :  { %1123 = vmatprep.subr.mxu1 %v82_v3  ;;  %1092 = vmatpush3.msra.mxu0 %v78_v2  ;;  %v12_v8 = vld [vmem:[%s1567_s0] sm:$0xff]  ;;  %v14_v14 = vld [vmem:[%s1567_s0 + $0x10] sm:$0xff]  ;;  %v15_v16 = vld [vmem:[%s1567_s0 + $0x18] sm:$0xff] }
   0x6   :  { %1124 = vmatpush3.msra.mxu1 %v82_v3  ;;  %1093 = vmatprep.subr.mxu0 %v77_v4  ;;  %v28_v9 = vld [vmem:[%s1567_s0 + $0x80] sm:$0xff]  ;;  %v30_v15 = vld [vmem:[%s1567_s0 + $0x90] sm:$0xff]  ;;  %v31_v17 = vld [vmem:[%s1567_s0 + $0x98] sm:$0xff] }
   0x7   :  { %1125 = vmatprep.subr.mxu1 %v81_v5  ;;  %1094 = vmatpush3.msra.mxu0 %v77_v4  ;;  %v16_v18 = vld [vmem:[%s1567_s0 + $0x20] sm:$0xff]  ;;  %v86_v20 = vld [vmem:[%s1568_s1 + $0x50] sm:$0xff]  ;;  %v17_v22 = vld [vmem:[%s1567_s0 + $0x28] sm:$0xff] }
   0x8   :  { %1126 = vmatpush3.msra.mxu1 %v81_v5  ;;  %1095 = vmatprep.subr.mxu0 %v76_v6  ;;  %v32_v19 = vld [vmem:[%s1567_s0 + $0xa0] sm:$0xff]  ;;  %v90_v21 = vld [vmem:[%s1568_s1 + $0x70] sm:$0xff]  ;;  %v33_v23 = vld [vmem:[%s1567_s0 + $0xa8] sm:$0xff] }
   0x9   :  { %1127 = vmatprep.subr.mxu1 %v80_v7  ;;  %1096 = vmatpush3.msra.mxu0 %v76_v6  ;;  %v18_v24 = vld [vmem:[%s1567_s0 + $0x30] sm:$0xff]  ;;  %v85_v26 = vld [vmem:[%s1568_s1 + $0x48] sm:$0xff]  ;;  %v19_v28 = vld [vmem:[%s1567_s0 + $0x38] sm:$0xff] }
   0xa   :  { %1097 = vmatprep.mubr.msk.f32.mxu0 %vm92_vm0, %v12_v8  ;;  %1128 = vmatpush3.msra.mxu1 %v80_v7  ;;  %v34_v25 = vld [vmem:[%s1567_s0 + $0xb0] sm:$0xff]  ;;  %v89_v27 = vld [vmem:[%s1568_s1 + $0x68] sm:$0xff]  ;;  %v35_v29 = vld [vmem:[%s1567_s0 + $0xb8] sm:$0xff] }
   0xb   :  { %1129 = vmatprep.mubr.msk.f32.mxu1 %vm92_vm0, %v28_v9  ;;  %1098 = vmatmul.mubr.msk.f32.vlgmr.msra.gmra.mxu0 %vm92_vm0, %v13_v10  ;;  %v20_v30 = vld [vmem:[%s1567_s0 + $0x40] sm:$0xff]  ;;  %v21_v34 = vld [vmem:[%s1567_s0 + $0x48] sm:$0xff]  ;;  %v22_v36 = vld [vmem:[%s1567_s0 + $0x50] sm:$0xff] }
   0xc   :  { %1130 = vmatmul.mubr.msk.f32.vlgmr.msra.gmra.mxu1 %vm92_vm0, %v29_v11  ;;  %1153 = vmatprep.subr.mxu0 %v87_v12  ;;  %v36_v31 = vld [vmem:[%s1567_s0 + $0xc0] sm:$0xff]  ;;  %v37_v35 = vld [vmem:[%s1567_s0 + $0xc8] sm:$0xff]  ;;  %v38_v37 = vld [vmem:[%s1567_s0 + $0xd0] sm:$0xff] }
   0xd   :  { %1185 = vmatprep.subr.mxu1 %v91_v13  ;;  %1154 = vmatpush3.msra.mxu0 %v87_v12  ;;  %v84_v32 = vld [vmem:[%s1568_s1 + $0x40] sm:$0xff] }
   0xe   :  { %1186 = vmatpush3.msra.mxu1 %v91_v13  ;;  %1100 = vmatprep.mubr.msk.f32.mxu0 %vm92_vm0, %v14_v14  ;;  %v88_v33 = vld [vmem:[%s1568_s1 + $0x60] sm:$0xff] }
   0xf   :  { %1132 = vmatprep.mubr.msk.f32.mxu1 %vm92_vm0, %v30_v15  ;;  %1101 = vmatmul.mubr.msk.f32.gmra.mxu0 %vm92_vm0, %v15_v16 }
  0x10   :  { %1133 = vmatmul.mubr.msk.f32.gmra.mxu1 %vm92_vm0, %v31_v17  ;;  %1103 = vmatprep.mubr.msk.f32.mxu0 %vm92_vm0, %v16_v18 }
  0x11   :  { %1135 = vmatprep.mubr.msk.f32.mxu1 %vm92_vm0, %v32_v19  ;;  %1155 = vmatprep.subr.mxu0 %v86_v20 }
  0x12   :  { %1187 = vmatprep.subr.mxu1 %v90_v21  ;;  %1156 = vmatpush3.msra.mxu0 %v86_v20 }
  0x13   :  { %1188 = vmatpush3.msra.mxu1 %v90_v21  ;;  %1104 = vmatmul.mubr.msk.f32.gmra.mxu0 %vm92_vm0, %v17_v22 }
  0x14   :  { %1136 = vmatmul.mubr.msk.f32.gmra.mxu1 %vm92_vm0, %v33_v23  ;;  %1106 = vmatprep.mubr.msk.f32.mxu0 %vm92_vm0, %v18_v24 }
  0x15   :  { %1138 = vmatprep.mubr.msk.f32.mxu1 %vm92_vm0, %v34_v25  ;;  %1157 = vmatprep.subr.mxu0 %v85_v26 }
  0x16   :  { %1189 = vmatprep.subr.mxu1 %v89_v27  ;;  %1158 = vmatpush3.msra.mxu0 %v85_v26 }
  0x17   :  { %1190 = vmatpush3.msra.mxu1 %v89_v27  ;;  %1107 = vmatmul.mubr.msk.f32.gmra.mxu0 %vm92_vm0, %v19_v28 }
  0x18   :  { %1139 = vmatmul.mubr.msk.f32.gmra.mxu1 %vm92_vm0, %v35_v29  ;;  %1109 = vmatprep.mubr.msk.f32.mxu0 %vm92_vm0, %v20_v30 }
  0x19   :  { %1141 = vmatprep.mubr.msk.f32.mxu1 %vm92_vm0, %v36_v31  ;;  %1159 = vmatprep.subr.mxu0 %v84_v32 }
  0x1a   :  { %1191 = vmatprep.subr.mxu1 %v88_v33  ;;  %1160 = vmatpush3.msra.mxu0 %v84_v32 }
  0x1b   :  { %1192 = vmatpush3.msra.mxu1 %v88_v33  ;;  %1110 = vmatmul.mubr.msk.f32.gmra.mxu0 %vm92_vm0, %v21_v34 }
  0x1c   :  { %1142 = vmatmul.mubr.msk.f32.gmra.mxu1 %vm92_vm0, %v37_v35 }
  0x1d   :  { %7 = vsyncpa [#allocation3], 0  ;;  %1112 = vmatprep.mubr.msk.f32.mxu0 %vm92_vm0, %v22_v36  ;;  %1144 = vmatprep.mubr.msk.f32.mxu1 %vm92_vm0, %v38_v37  ;;  %v23_v38 = vld [vmem:[%s1567_s0 + $0x58] sm:$0xff]  ;;  %v24_v40 = vld [vmem:[%s1567_s0 + $0x60] sm:$0xff] }
  0x1e   :  { %v39_v39 = vld [vmem:[%s1567_s0 + $0xd8] sm:$0xff]  ;;  %v40_v41 = vld [vmem:[%s1567_s0 + $0xe0] sm:$0xff]  ;;  %v25_v42 = vld [vmem:[%s1567_s0 + $0x68] sm:$0xff] }
  0x1f   :  { %1113 = vmatmul.mubr.msk.f32.gmra.mxu0 %vm92_vm0, %v23_v38  ;;  %v41_v43 = vld [vmem:[%s1567_s0 + $0xe8] sm:$0xff]  ;;  %v26_v44 = vld [vmem:[%s1567_s0 + $0x70] sm:$0xff]  ;;  %v27_v46 = vld [vmem:[%s1567_s0 + $0x78] sm:$0xff] }
  0x20   :  { %1145 = vmatmul.mubr.msk.f32.gmra.mxu1 %vm92_vm0, %v39_v39  ;;  %1115 = vmatprep.mubr.msk.f32.mxu0 %vm92_vm0, %v24_v40  ;;  %v42_v45 = vld [vmem:[%s1567_s0 + $0xf0] sm:$0xff]  ;;  %v43_v47 = vld [vmem:[%s1567_s0 + $0xf8] sm:$0xff]  ;;  %v44_v48 = vld [vmem:[%s1567_s0 + $0x100] sm:$0xff] }
  0x21   :  { %1147 = vmatprep.mubr.msk.f32.mxu1 %vm92_vm0, %v40_v41  ;;  %v60_v49 = vld [vmem:[%s1567_s0 + $0x180] sm:$0xff]  ;;  %v45_v50 = vld [vmem:[%s1567_s0 + $0x108] sm:$0xff]  ;;  %v46_v52 = vld [vmem:[%s1567_s0 + $0x110] sm:$0xff] }
  0x22   :  { %v61_v51 = vld [vmem:[%s1567_s0 + $0x188] sm:$0xff]  ;;  %v62_v53 = vld [vmem:[%s1567_s0 + $0x190] sm:$0xff]  ;;  %v47_v54 = vld [vmem:[%s1567_s0 + $0x118] sm:$0xff] }
  0x23   :  { %1116 = vmatmul.mubr.msk.f32.gmra.mxu0 %vm92_vm0, %v25_v42  ;;  %v63_v55 = vld [vmem:[%s1567_s0 + $0x198] sm:$0xff]  ;;  %v48_v56 = vld [vmem:[%s1567_s0 + $0x120] sm:$0xff]  ;;  %v49_v58 = vld [vmem:[%s1567_s0 + $0x128] sm:$0xff] }
  0x24   :  { %1148 = vmatmul.mubr.msk.f32.gmra.mxu1 %vm92_vm0, %v41_v43  ;;  %1118 = vmatprep.mubr.msk.f32.mxu0 %vm92_vm0, %v26_v44  ;;  %v64_v57 = vld [vmem:[%s1567_s0 + $0x1a0] sm:$0xff]  ;;  %v65_v59 = vld [vmem:[%s1567_s0 + $0x1a8] sm:$0xff]  ;;  %v50_v60 = vld [vmem:[%s1567_s0 + $0x130] sm:$0xff] }
  0x25   :  { %1150 = vmatprep.mubr.msk.f32.mxu1 %vm92_vm0, %v42_v45  ;;  %v66_v61 = vld [vmem:[%s1567_s0 + $0x1b0] sm:$0xff]  ;;  %v51_v62 = vld [vmem:[%s1567_s0 + $0x138] sm:$0xff]  ;;  %v52_v0 = vld [vmem:[%s1567_s0 + $0x140] sm:$0xff] }
  0x26   :  { %v67_v63 = vld [vmem:[%s1567_s0 + $0x1b8] sm:$0xff]  ;;  %v68_v1 = vld [vmem:[%s1567_s0 + $0x1c0] sm:$0xff]  ;;  %v53_v2 = vld [vmem:[%s1567_s0 + $0x148] sm:$0xff] }
  0x27   :  { %1119 = vmatmul.mubr.msk.f32.gmra.mxu0 %vm92_vm0, %v27_v46  ;;  %v69_v3 = vld [vmem:[%s1567_s0 + $0x1c8] sm:$0xff]  ;;  %v54_v4 = vld [vmem:[%s1567_s0 + $0x150] sm:$0xff]  ;;  %v55_v6 = vld [vmem:[%s1567_s0 + $0x158] sm:$0xff] }
  0x28   :  { %1151 = vmatmul.mubr.msk.f32.gmra.mxu1 %vm92_vm0, %v43_v47  ;;  %1161 = vmatprep.mubr.msk.f32.mxu0 %vm92_vm0, %v44_v48  ;;  %v70_v5 = vld [vmem:[%s1567_s0 + $0x1d0] sm:$0xff]  ;;  %v71_v7 = vld [vmem:[%s1567_s0 + $0x1d8] sm:$0xff]  ;;  %v56_v8 = vld [vmem:[%s1567_s0 + $0x160] sm:$0xff] }
  0x29   :  { %1193 = vmatprep.mubr.msk.f32.mxu1 %vm92_vm0, %v60_v49  ;;  %v72_v9 = vld [vmem:[%s1567_s0 + $0x1e0] sm:$0xff]  ;;  %v57_v10 = vld [vmem:[%s1567_s0 + $0x168] sm:$0xff]  ;;  %v58_v12 = vld [vmem:[%s1567_s0 + $0x170] sm:$0xff] }
  0x2a   :  { %v73_v11 = vld [vmem:[%s1567_s0 + $0x1e8] sm:$0xff]  ;;  %v74_v13 = vld [vmem:[%s1567_s0 + $0x1f0] sm:$0xff]  ;;  %v59_v14 = vld [vmem:[%s1567_s0 + $0x178] sm:$0xff] }
  0x2b   :  { %1162 = vmatmul.mubr.msk.f32.vlgmr.msra.gmra.mxu0 %vm92_vm0, %v45_v50  ;;  %v75_v15 = vld [vmem:[%s1567_s0 + $0x1f8] sm:$0xff]  ;;  %s1242_s0 = smov [#allocation2]  }
  0x2c   :  { %1194 = vmatmul.mubr.msk.f32.vlgmr.msra.gmra.mxu1 %vm92_vm0, %v61_v51  ;;  %1164 = vmatprep.mubr.msk.f32.mxu0 %vm92_vm0, %v46_v52  ;;  %s934_s26 = sshll.u32 %s1242_s0, 4  ;;  %s935_s26 = int_to_ptr.vmem [resolvable:$true] %s934_s26 }
  0x2d   :  { %1196 = vmatprep.mubr.msk.f32.mxu1 %vm92_vm0, %v62_v53  ;;  %s1220_s1 = scalar_lea.vmem %s935_s26, 8192  ;;  %p1225_p1 = scmp.lt.s32.totalorder %s935_s26, %s935_s26 }
  0x2e   :  { %p1221_p0 = scmp.ne.s32.totalorder %s935_s26, %s1220_s1  ;;  %p1226_p2 = scmp.lt.s32.totalorder %s1220_s1, %s1220_s1 }
  0x2f   :  { %1165 = vmatmul.mubr.msk.f32.gmra.mxu0 %vm92_vm0, %v47_v54 }
  0x30   :  { %1197 = vmatmul.mubr.msk.f32.gmra.mxu1 %vm92_vm0, %v63_v55  ;;  %1167 = vmatprep.mubr.msk.f32.mxu0 %vm92_vm0, %v48_v56  ;;  %p1227_p3 = por %p1226_p2, %p1225_p1 }
  0x31   :  { %1199 = vmatprep.mubr.msk.f32.mxu1 %vm92_vm0, %v64_v57 }
  0x32   :  { %p1228_p4 = pnand %p1227_p3, %p1221_p0 }
  0x33   :  { %1168 = vmatmul.mubr.msk.f32.gmra.mxu0 %vm92_vm0, %v49_v58 }
  0x34   :  { %1200 = vmatmul.mubr.msk.f32.gmra.mxu1 %vm92_vm0, %v65_v59  ;;  %1170 = vmatprep.mubr.msk.f32.mxu0 %vm92_vm0, %v50_v60 }
  0x35   :  { %1202 = vmatprep.mubr.msk.f32.mxu1 %vm92_vm0, %v66_v61 }
  0x37   :  { %1171 = vmatmul.mubr.msk.f32.gmra.mxu0 %vm92_vm0, %v51_v62 }
  0x38   :  { %1203 = vmatmul.mubr.msk.f32.gmra.mxu1 %vm92_vm0, %v67_v63  ;;  %1173 = vmatprep.mubr.msk.f32.mxu0 %vm92_vm0, %v52_v0 }
  0x39   :  { %1205 = vmatprep.mubr.msk.f32.mxu1 %vm92_vm0, %v68_v1 }
  0x3b   :  { %1174 = vmatmul.mubr.msk.f32.gmra.mxu0 %vm92_vm0, %v53_v2 }
  0x3c   :  { %1206 = vmatmul.mubr.msk.f32.gmra.mxu1 %vm92_vm0, %v69_v3  ;;  %1176 = vmatprep.mubr.msk.f32.mxu0 %vm92_vm0, %v54_v4 }
  0x3d   :  { %1208 = vmatprep.mubr.msk.f32.mxu1 %vm92_vm0, %v70_v5 }
  0x3f   :  { %1177 = vmatmul.mubr.msk.f32.gmra.mxu0 %vm92_vm0, %v55_v6 }
  0x40   :  { %1209 = vmatmul.mubr.msk.f32.gmra.mxu1 %vm92_vm0, %v71_v7  ;;  %1179 = vmatprep.mubr.msk.f32.mxu0 %vm92_vm0, %v56_v8 }
  0x41   :  { %1211 = vmatprep.mubr.msk.f32.mxu1 %vm92_vm0, %v72_v9 }
  0x43   :  { %1180 = vmatmul.mubr.msk.f32.gmra.mxu0 %vm92_vm0, %v57_v10 }
  0x44   :  { %1212 = vmatmul.mubr.msk.f32.gmra.mxu1 %vm92_vm0, %v73_v11  ;;  %1182 = vmatprep.mubr.msk.f32.mxu0 %vm92_vm0, %v58_v12 }
  0x45   :  { %1214 = vmatprep.mubr.msk.f32.mxu1 %vm92_vm0, %v74_v13 }
  0x47   :  { %1183 = vmatmul.mubr.msk.f32.gmra.mxu0 %vm92_vm0, %v59_v14 }
  0x48   :  { %1215 = vmatmul.mubr.msk.f32.gmra.mxu1 %vm92_vm0, %v75_v15 }
  0xcb   :  { %v1099_v16 = vpop.f32.mrf.mxu0 }
  0xcc   :  { %v1131_v17 = vpop.f32.mrf.mxu1  ;;  %866 = vst [vmem:[#allocation2 + $0x8] sm:$0xff] %v1099_v16 }
  0xcd   :  { %882 = vst [vmem:[#allocation2 + $0x88] sm:$0xff] %v1131_v17  ;;  %v207_v18 = vpop.f32.mrf.mxu0 }
  0xce   :  { %v400_v19 = vpop.f32.mrf.mxu1  ;;  %865 = vst [vmem:[#allocation2] sm:$0xff] %v207_v18 }
  0xcf   :  { %881 = vst [vmem:[#allocation2 + $0x80] sm:$0xff] %v400_v19  ;;  %v1102_v20 = vpop.f32.mrf.mxu0 }
  0xd0   :  { %v1134_v21 = vpop.f32.mrf.mxu1  ;;  %868 = vst [vmem:[#allocation2 + $0x18] sm:$0xff] %v1102_v20 }
  0xd1   :  { %884 = vst [vmem:[#allocation2 + $0x98] sm:$0xff] %v1134_v21  ;;  %v217_v22 = vpop.f32.mrf.mxu0 }
  0xd2   :  { %v410_v23 = vpop.f32.mrf.mxu1  ;;  %867 = vst [vmem:[#allocation2 + $0x10] sm:$0xff] %v217_v22 }
  0xd3   :  { %883 = vst [vmem:[#allocation2 + $0x90] sm:$0xff] %v410_v23  ;;  %v1105_v24 = vpop.f32.mrf.mxu0 }
  0xd4   :  { %v1137_v25 = vpop.f32.mrf.mxu1  ;;  %870 = vst [vmem:[#allocation2 + $0x28] sm:$0xff] %v1105_v24 }
  0xd5   :  { %886 = vst [vmem:[#allocation2 + $0xa8] sm:$0xff] %v1137_v25  ;;  %v227_v26 = vpop.f32.mrf.mxu0 }
  0xd6   :  { %v420_v27 = vpop.f32.mrf.mxu1  ;;  %869 = vst [vmem:[#allocation2 + $0x20] sm:$0xff] %v227_v26 }
  0xd7   :  { %885 = vst [vmem:[#allocation2 + $0xa0] sm:$0xff] %v420_v27  ;;  %v1108_v28 = vpop.f32.mrf.mxu0 }
  0xd8   :  { %v1140_v29 = vpop.f32.mrf.mxu1  ;;  %872 = vst [vmem:[#allocation2 + $0x38] sm:$0xff] %v1108_v28 }
  0xd9   :  { %888 = vst [vmem:[#allocation2 + $0xb8] sm:$0xff] %v1140_v29  ;;  %v237_v30 = vpop.f32.mrf.mxu0 }
  0xda   :  { %v430_v31 = vpop.f32.mrf.mxu1  ;;  %871 = vst [vmem:[#allocation2 + $0x30] sm:$0xff] %v237_v30 }
  0xdb   :  { %887 = vst [vmem:[#allocation2 + $0xb0] sm:$0xff] %v430_v31  ;;  %v1111_v32 = vpop.f32.mrf.mxu0 }
  0xdc   :  { %v1143_v33 = vpop.f32.mrf.mxu1  ;;  %874 = vst [vmem:[#allocation2 + $0x48] sm:$0xff] %v1111_v32 }
  0xdd   :  { %890 = vst [vmem:[#allocation2 + $0xc8] sm:$0xff] %v1143_v33  ;;  %v247_v34 = vpop.f32.mrf.mxu0 }
  0xde   :  { %v440_v35 = vpop.f32.mrf.mxu1  ;;  %873 = vst [vmem:[#allocation2 + $0x40] sm:$0xff] %v247_v34 }
  0xdf   :  { %889 = vst [vmem:[#allocation2 + $0xc0] sm:$0xff] %v440_v35  ;;  %v1114_v36 = vpop.f32.mrf.mxu0 }
  0xe0   :  { %v1146_v37 = vpop.f32.mrf.mxu1  ;;  %876 = vst [vmem:[#allocation2 + $0x58] sm:$0xff] %v1114_v36 }
  0xe1   :  { %892 = vst [vmem:[#allocation2 + $0xd8] sm:$0xff] %v1146_v37  ;;  %v257_v38 = vpop.f32.mrf.mxu0 }
  0xe2   :  { %v450_v39 = vpop.f32.mrf.mxu1  ;;  %875 = vst [vmem:[#allocation2 + $0x50] sm:$0xff] %v257_v38 }
  0xe3   :  { %891 = vst [vmem:[#allocation2 + $0xd0] sm:$0xff] %v450_v39  ;;  %v1117_v40 = vpop.f32.mrf.mxu0 }
  0xe4   :  { %v1149_v41 = vpop.f32.mrf.mxu1  ;;  %878 = vst [vmem:[#allocation2 + $0x68] sm:$0xff] %v1117_v40 }
  0xe5   :  { %894 = vst [vmem:[#allocation2 + $0xe8] sm:$0xff] %v1149_v41  ;;  %v267_v42 = vpop.f32.mrf.mxu0 }
  0xe6   :  { %v460_v43 = vpop.f32.mrf.mxu1  ;;  %877 = vst [vmem:[#allocation2 + $0x60] sm:$0xff] %v267_v42 }
  0xe7   :  { %893 = vst [vmem:[#allocation2 + $0xe0] sm:$0xff] %v460_v43  ;;  %v1120_v44 = vpop.f32.mrf.mxu0 }
  0xe8   :  { %v1152_v45 = vpop.f32.mrf.mxu1  ;;  %880 = vst [vmem:[#allocation2 + $0x78] sm:$0xff] %v1120_v44 }
  0xe9   :  { %896 = vst [vmem:[#allocation2 + $0xf8] sm:$0xff] %v1152_v45  ;;  %v277_v46 = vpop.f32.mrf.mxu0 }
  0xea   :  { %v470_v47 = vpop.f32.mrf.mxu1  ;;  %879 = vst [vmem:[#allocation2 + $0x70] sm:$0xff] %v277_v46 }
  0xeb   :  { %895 = vst [vmem:[#allocation2 + $0xf0] sm:$0xff] %v470_v47  ;;  %v1163_v48 = vpop.f32.mrf.mxu0 }
  0xec   :  { %v1195_v49 = vpop.f32.mrf.mxu1  ;;  %898 = vst [vmem:[#allocation2 + $0x108] sm:$0xff] %v1163_v48 }
  0xed   :  { %914 = vst [vmem:[#allocation2 + $0x188] sm:$0xff] %v1195_v49  ;;  %v593_v50 = vpop.f32.mrf.mxu0 }
  0xee   :  { %v786_v51 = vpop.f32.mrf.mxu1  ;;  %897 = vst [vmem:[#allocation2 + $0x100] sm:$0xff] %v593_v50 }
  0xef   :  { %913 = vst [vmem:[#allocation2 + $0x180] sm:$0xff] %v786_v51  ;;  %v1166_v52 = vpop.f32.mrf.mxu0 }
  0xf0   :  { %v1198_v53 = vpop.f32.mrf.mxu1  ;;  %900 = vst [vmem:[#allocation2 + $0x118] sm:$0xff] %v1166_v52 }
  0xf1   :  { %916 = vst [vmem:[#allocation2 + $0x198] sm:$0xff] %v1198_v53  ;;  %v603_v54 = vpop.f32.mrf.mxu0 }
  0xf2   :  { %v796_v55 = vpop.f32.mrf.mxu1  ;;  %899 = vst [vmem:[#allocation2 + $0x110] sm:$0xff] %v603_v54 }
  0xf3   :  { %915 = vst [vmem:[#allocation2 + $0x190] sm:$0xff] %v796_v55  ;;  %v1169_v56 = vpop.f32.mrf.mxu0 }
  0xf4   :  { %v1201_v57 = vpop.f32.mrf.mxu1  ;;  %902 = vst [vmem:[#allocation2 + $0x128] sm:$0xff] %v1169_v56 }
  0xf5   :  { %918 = vst [vmem:[#allocation2 + $0x1a8] sm:$0xff] %v1201_v57  ;;  %v613_v58 = vpop.f32.mrf.mxu0 }
  0xf6   :  { %v806_v59 = vpop.f32.mrf.mxu1  ;;  %901 = vst [vmem:[#allocation2 + $0x120] sm:$0xff] %v613_v58 }
  0xf7   :  { %917 = vst [vmem:[#allocation2 + $0x1a0] sm:$0xff] %v806_v59  ;;  %v1172_v60 = vpop.f32.mrf.mxu0 }
  0xf8   :  { %v1204_v61 = vpop.f32.mrf.mxu1  ;;  %904 = vst [vmem:[#allocation2 + $0x138] sm:$0xff] %v1172_v60 }
  0xf9   :  { %920 = vst [vmem:[#allocation2 + $0x1b8] sm:$0xff] %v1204_v61  ;;  %v623_v62 = vpop.f32.mrf.mxu0 }
  0xfa   :  { %v816_v63 = vpop.f32.mrf.mxu1  ;;  %903 = vst [vmem:[#allocation2 + $0x130] sm:$0xff] %v623_v62 }
  0xfb   :  { %919 = vst [vmem:[#allocation2 + $0x1b0] sm:$0xff] %v816_v63  ;;  %v1175_v0 = vpop.f32.mrf.mxu0 }
  0xfc   :  { %v1207_v1 = vpop.f32.mrf.mxu1  ;;  %906 = vst [vmem:[#allocation2 + $0x148] sm:$0xff] %v1175_v0 }
  0xfd   :  { %922 = vst [vmem:[#allocation2 + $0x1c8] sm:$0xff] %v1207_v1  ;;  %v633_v2 = vpop.f32.mrf.mxu0 }
  0xfe   :  { %v826_v3 = vpop.f32.mrf.mxu1  ;;  %905 = vst [vmem:[#allocation2 + $0x140] sm:$0xff] %v633_v2 }
  0xff   :  { %921 = vst [vmem:[#allocation2 + $0x1c0] sm:$0xff] %v826_v3  ;;  %v1178_v4 = vpop.f32.mrf.mxu0 }
 0x100   :  { %v1210_v5 = vpop.f32.mrf.mxu1  ;;  %908 = vst [vmem:[#allocation2 + $0x158] sm:$0xff] %v1178_v4 }
 0x101   :  { %924 = vst [vmem:[#allocation2 + $0x1d8] sm:$0xff] %v1210_v5  ;;  %v643_v6 = vpop.f32.mrf.mxu0 }
 0x102   :  { %v836_v7 = vpop.f32.mrf.mxu1  ;;  %907 = vst [vmem:[#allocation2 + $0x150] sm:$0xff] %v643_v6 }
 0x103   :  { %923 = vst [vmem:[#allocation2 + $0x1d0] sm:$0xff] %v836_v7  ;;  %v1181_v8 = vpop.f32.mrf.mxu0 }
 0x104   :  { %v1213_v9 = vpop.f32.mrf.mxu1  ;;  %910 = vst [vmem:[#allocation2 + $0x168] sm:$0xff] %v1181_v8 }
 0x105   :  { %926 = vst [vmem:[#allocation2 + $0x1e8] sm:$0xff] %v1213_v9  ;;  %v653_v10 = vpop.f32.mrf.mxu0 }
 0x106   :  { %v846_v11 = vpop.f32.mrf.mxu1  ;;  %909 = vst [vmem:[#allocation2 + $0x160] sm:$0xff] %v653_v10 }
 0x107   :  { %925 = vst [vmem:[#allocation2 + $0x1e0] sm:$0xff] %v846_v11  ;;  %v1184_v12 = vpop.f32.mrf.mxu0 }
 0x108   :  { %v1216_v13 = vpop.f32.mrf.mxu1  ;;  %912 = vst [vmem:[#allocation2 + $0x178] sm:$0xff] %v1184_v12 }
 0x109   :  { %928 = vst [vmem:[#allocation2 + $0x1f8] sm:$0xff] %v1216_v13  ;;  %v663_v14 = vpop.f32.mrf.mxu0 }
 0x10a   :  { %v856_v15 = vpop.f32.mrf.mxu1  ;;  %911 = vst [vmem:[#allocation2 + $0x170] sm:$0xff] %v663_v14 }
 0x10b   :  { %927 = vst [vmem:[#allocation2 + $0x1f0] sm:$0xff] %v856_v15 }
 0x10c   :  { %1231 = shalt.err (!%p1228_p4)
}
 0x10d   :  { %s1243_s27 = smov 128   ;;  %s1244_s28 = smov 8  }
 0x10e   :  { %940 = dma.vmem_to_hbm [thread:$0]  %s935_s26, 8192, %s1569_s2, [#allocation3], %s1243_s27, %s1243_s27, %s1244_s28  }
 0x10f   :  { %1240 = dma.done.wait [#allocation3], 8192  }
 0x110   :  { %1241 = vsyncadd [#allocation3], 4294959104 }
 0x111   :  { %944 = vsyncpa [#allocation3], 1 }

</bundles_post_ra>
